<compile_context>
chip_gen: v7x
topology: tpu7x:2x2x1
jax: 0.10.0
libtpu: 0.0.40
codegen_flags: <defaults>
</compile_context>

<pallas_src>
import functools

import jax
import jax.numpy as jnp
from jax.experimental import pallas as pl
from jax.experimental.pallas import tpu as pltpu

_LANES = 128
_MAX_TILE_ROWS = 1024  # 1024 x 128 x 4B = 512 KiB per block per input


def _focal_loss_kernel(x_ref, y_ref, o_ref, acc_ref, *,
                       alpha, gamma, n_elems, n_rows, tile_rows, mask_tail):
    i = pl.program_id(0)
    last = pl.num_programs(0) - 1

    @pl.when(i == 0)
    def _():
        acc_ref[...] = jnp.zeros_like(acc_ref)

    x = x_ref[...].astype(jnp.float32)
    y = y_ref[...].astype(jnp.float32)

    # Numerically stable BCE-with-logits, per element:
    #   loss = max(x, 0) - x*y + log(1 + exp(-|x|))
    per_elem = jnp.maximum(x, 0.0) - x * y + jnp.log1p(jnp.exp(-jnp.abs(x)))

    if mask_tail:
        # Only the last block can contain out-of-bounds (garbage) rows; mask
        # them there and keep the hot path mask-free.
        is_last = i == last

        @pl.when(is_last)
        def _():
            rows_left = n_rows - i * tile_rows
            row_ids = jax.lax.broadcasted_iota(jnp.int32, (tile_rows, 1), 0)
            masked = jnp.where(row_ids < rows_left, per_elem, 0.0)
            acc_ref[...] += jnp.sum(masked, axis=0, keepdims=True)

        @pl.when(jnp.logical_not(is_last))
        def _():
            acc_ref[...] += jnp.sum(per_elem, axis=0, keepdims=True)
    else:
        acc_ref[...] += jnp.sum(per_elem, axis=0, keepdims=True)

    @pl.when(i == last)
    def _():
        total = jnp.sum(acc_ref[...])                 # final cross-lane reduce
        bce = total / jnp.float32(n_elems)            # mean over real elements
        pt = jnp.exp(-bce)
        one_m_pt = 1.0 - pt
        g = float(gamma)
        if g == int(g) and g >= 0:
            mod = jnp.float32(1.0)
            for _ in range(int(g)):                   # multiply chain, no pow
                mod = mod * one_m_pt
        else:
            mod = one_m_pt ** jnp.float32(g)
        o_ref[0, 0] = jnp.float32(alpha) * mod * bce


def focal_loss(inputs, targets, alpha=1.0, gamma=2.0):
    """Scalar focal loss matching PyTorch FocalLoss.forward (reduce=True path)."""
    assert inputs.shape == targets.shape
    n_elems = int(inputs.size)

    # Flatten in native dtype (no f32 promotion in the wrapper).
    flat_x = jnp.ravel(inputs)
    flat_y = jnp.ravel(targets)

    # Minimal sentinel padding only if not lane-aligned:
    #   x = -1e9, y = 0  ->  max(x,0) - x*y + log1p(exp(-|x|)) == 0 exactly,
    # so the padded tail contributes nothing and needs no element mask.
    pad = (-n_elems) % _LANES
    if pad:
        flat_x = jnp.pad(flat_x, (0, pad), constant_values=-1e9)
        flat_y = jnp.pad(flat_y, (0, pad), constant_values=0.0)

    n_rows = (n_elems + pad) // _LANES
    x2d = flat_x.reshape(n_rows, _LANES)
    y2d = flat_y.reshape(n_rows, _LANES)

    if n_rows <= _MAX_TILE_ROWS:
        tile_rows = n_rows           # single block == full array dims (legal)
    else:
        tile_rows = _MAX_TILE_ROWS   # multiple of 8 -> legal block shape
    num_blocks = -(-n_rows // tile_rows)
    mask_tail = (n_rows % tile_rows) != 0

    kernel = functools.partial(
        _focal_loss_kernel,
        alpha=float(alpha), gamma=float(gamma),
        n_elems=n_elems, n_rows=n_rows, tile_rows=tile_rows,
        mask_tail=mask_tail)

    out = pl.pallas_call(
        kernel,
        out_shape=jax.ShapeDtypeStruct((1, 1), jnp.float32),
        grid=(num_blocks,),
        in_specs=[
            pl.BlockSpec((tile_rows, _LANES), lambda i: (i, 0)),
            pl.BlockSpec((tile_rows, _LANES), lambda i: (i, 0)),
        ],
        out_specs=pl.BlockSpec((1, 1), lambda i: (0, 0),
                               memory_space=pltpu.SMEM),
        scratch_shapes=[pltpu.VMEM((1, _LANES), jnp.float32)],
        compiler_params=pltpu.CompilerParams(
            dimension_semantics=("arbitrary",)),
    )(x2d, y2d)
    return out[0, 0]


def _reference(inputs, targets, alpha=1.0, gamma=2.0):
    x = inputs.astype(jnp.float32)
    y = targets.astype(jnp.float32)
    per = jnp.maximum(x, 0.0) - x * y + jnp.log1p(jnp.exp(-jnp.abs(x)))
    bce = jnp.mean(per)
    pt = jnp.exp(-bce)
    return alpha * (1.0 - pt) ** gamma * bce


if __name__ == "__main__":
    key = jax.random.PRNGKey(0)
    k1, k2 = jax.random.split(key)
    # NCHW inputs, consistent with a typical segmentation/detection logit map.
    x = jax.random.normal(k1, (2, 4, 16, 16), dtype=jnp.float32)
    t = (jax.random.uniform(k2, (2, 4, 16, 16)) > 0.5).astype(jnp.float32)

    out = focal_loss(x, t, alpha=1.0, gamma=2.0)
    out = jax.block_until_ready(out)

    ref = _reference(x, t, alpha=1.0, gamma=2.0)
    assert jnp.allclose(out, ref, rtol=1e-5, atol=1e-6), (out, ref)

    print("KERNEL_OK")
</pallas_src>

<mosaic_0001>
module attributes {stable_mosaic.version = 11 : i64} {
  func.func @_focal_loss_kernel(%arg0: i32, %arg1: memref<16x128xf32, #tpu.memory_space<vmem>>, %arg2: memref<16x128xf32, #tpu.memory_space<vmem>>, %arg3: memref<1x1xf32, #tpu.memory_space<smem>>, %arg4: memref<1x128xf32, #tpu.memory_space<vmem>>) attributes {dimension_semantics = [#tpu.dimension_semantics<arbitrary>], iteration_bounds = array<i64: 1>, scalar_prefetch = 0 : i64, scratch_operands = 1 : i64, tpu.core_type = #tpu.core_type<tc>, window_params = [{transform_indices = @transform_0, window_bounds = array<i64: 16, 128>}, {transform_indices = @transform_1, window_bounds = array<i64: 16, 128>}, {transform_indices = @transform_2, window_bounds = array<i64: 1, 1>}]} {
    %c0_i32 = arith.constant 0 : i32
    %0 = arith.cmpi eq, %arg0, %c0_i32 : i32
    %1 = arith.extui %0 : i1 to i32
    %c0_i32_0 = arith.constant 0 : i32
    %2 = arith.cmpi ne, %1, %c0_i32_0 : i32
    scf.if %2 {
      %cst_12 = arith.constant 0.000000e+00 : f32
      %23 = vector.broadcast %cst_12 : f32 to vector<1x128xf32>
      %c0_13 = arith.constant 0 : index
      %c0_14 = arith.constant 0 : index
      %24 = vector.load %arg4[%c0_13, %c0_14] : memref<1x128xf32, #tpu.memory_space<vmem>>, vector<1x128xf32>
      tpu.vector_store %arg4[%c0_13, %c0_14], %23 {strides = array<i32>} : memref<1x128xf32, #tpu.memory_space<vmem>>, vector<1x128xf32>,
    } else {
    }
    %c0 = arith.constant 0 : index
    %c0_1 = arith.constant 0 : index
    %3 = vector.load %arg1[%c0, %c0_1] : memref<16x128xf32, #tpu.memory_space<vmem>>, vector<16x128xf32>
    %c0_2 = arith.constant 0 : index
    %c0_3 = arith.constant 0 : index
    %4 = vector.load %arg2[%c0_2, %c0_3] : memref<16x128xf32, #tpu.memory_space<vmem>>, vector<16x128xf32>
    %cst = arith.constant 0.000000e+00 : f32
    %5 = vector.broadcast %cst : f32 to vector<16x128xf32>
    %6 = arith.maximumf %3, %5 : vector<16x128xf32>
    %7 = arith.mulf %3, %4 : vector<16x128xf32>
    %8 = arith.subf %6, %7 : vector<16x128xf32>
    %9 = math.absf %3 : vector<16x128xf32>
    %cst_4 = arith.constant 0.000000e+00 : f32
    %10 = vector.broadcast %cst_4 : f32 to vector<16x128xf32>
    %11 = arith.subf %10, %9 : vector<16x128xf32>
    %12 = math.exp %11 : vector<16x128xf32>
    %13 = math.log1p %12 : vector<16x128xf32>
    %14 = arith.addf %8, %13 : vector<16x128xf32>
    %c0_5 = arith.constant 0 : index
    %c0_6 = arith.constant 0 : index
    %15 = vector.load %arg4[%c0_5, %c0_6] : memref<1x128xf32, #tpu.memory_space<vmem>>, vector<1x128xf32>
    %cst_7 = arith.constant dense<0.000000e+00> : vector<128xf32>
    %16 = vector.multi_reduction <add>, %14, %cst_7 [0] : vector<16x128xf32> to vector<128xf32>
    %17 = vector.shape_cast %16 : vector<128xf32> to vector<1x128xf32>
    %18 = arith.addf %15, %17 : vector<1x128xf32>
    %c0_8 = arith.constant 0 : index
    %c0_9 = arith.constant 0 : index
    %19 = vector.load %arg4[%c0_8, %c0_9] : memref<1x128xf32, #tpu.memory_space<vmem>>, vector<1x128xf32>
    tpu.vector_store %arg4[%c0_8, %c0_9], %18 {strides = array<i32>} : memref<1x128xf32, #tpu.memory_space<vmem>>, vector<1x128xf32>,
    %c0_i32_10 = arith.constant 0 : i32
    %20 = arith.cmpi eq, %arg0, %c0_i32_10 : i32
    %21 = arith.extui %20 : i1 to i32
    %c0_i32_11 = arith.constant 0 : i32
    %22 = arith.cmpi ne, %21, %c0_i32_11 : i32
    scf.if %22 {
      %c0_12 = arith.constant 0 : index
      %c0_13 = arith.constant 0 : index
      %23 = vector.load %arg4[%c0_12, %c0_13] : memref<1x128xf32, #tpu.memory_space<vmem>>, vector<1x128xf32>
      %24 = vector.shape_cast %23 : vector<1x128xf32> to vector<1x1x128xf32>
      %cst_14 = arith.constant dense<0.000000e+00> : vector<1xf32>
      %25 = vector.multi_reduction <add>, %24, %cst_14 [1, 2] : vector<1x1x128xf32> to vector<1xf32>
      %26 = vector.shape_cast %25 : vector<1xf32> to vector<1x1x1xf32>
      %27 = vector.extract %26[0, 0, 0] : f32 from vector<1x1x1xf32>
      %cst_15 = arith.constant 2.048000e+03 : f32
      %28 = arith.divf %27, %cst_15 : f32
      %cst_16 = arith.constant 0.000000e+00 : f32
      %29 = arith.subf %cst_16, %28 : f32
      %30 = math.exp %29 : f32
      %cst_17 = arith.constant 1.000000e+00 : f32
      %31 = arith.subf %cst_17, %30 : f32
      %cst_18 = arith.constant 1.000000e+00 : f32
      %32 = arith.mulf %cst_18, %31 : f32
      %33 = arith.mulf %32, %31 : f32
      %cst_19 = arith.constant 1.000000e+00 : f32
      %34 = arith.mulf %cst_19, %33 : f32
      %35 = arith.mulf %34, %28 : f32
      %c0_20 = arith.constant 0 : index
      %c0_21 = arith.constant 0 : index
      %36 = memref.load %arg3[%c0_20, %c0_21] : memref<1x1xf32, #tpu.memory_space<smem>>
      memref.store %35, %arg3[%c0_20, %c0_21] : memref<1x1xf32, #tpu.memory_space<smem>>
    } else {
    }
    return
  }
  func.func @transform_0(%arg0: i32) -> (i32, i32) {
    %c0_i32 = arith.constant 0 : i32
    %c0_i32_0 = arith.constant 0 : i32
    return %arg0, %c0_i32 : i32, i32
  }
  func.func @transform_1(%arg0: i32) -> (i32, i32) {
    %c0_i32 = arith.constant 0 : i32
    %c0_i32_0 = arith.constant 0 : i32
    return %arg0, %c0_i32 : i32, i32
  }
  func.func @transform_2(%arg0: i32) -> (i32, i32) {
    %c0_i32 = arith.constant 0 : i32
    %c0_i32_0 = arith.constant 0 : i32
    %c0_i32_1 = arith.constant 0 : i32
    return %c0_i32, %c0_i32_0 : i32, i32
  }
}

</mosaic_0001>

<bundles_post_ra>
// kernel: tpu_custom_call.1
= control target key start
LH: loop header
LB: loop body
LE: loop exit
PB: predicated region body
PF: predicated region fallthrough
CT: control target
= control target key end

     0   :  { %7 = vsyncpa [#allocation4], 0  ;;  %s273_s0 = inlined_call_operand.hbm [shape: f32[16,128], index: 0, kind: input, shape index: {}]   ;;  %s274_s1 = inlined_call_operand.hbm [shape: f32[16,128], index: 1, kind: input, shape index: {}]   ;;  %s275_s2 = inlined_call_operand.hbm [shape: f32[1,1], index: 2, kind: output, shape index: {}]  }
   0x1   :  { %8 = vsyncpa [#allocation7], 0 }
   0x2   :  { %9 = vsyncpa [#allocation5], 0  ;;  %s216_s9 = smov [#allocation3]   ;;  %s156_s13 = scalar_lea.hbm %s273_s0, 256 }
   0x3   :  { %s15_s10 = sshll.u32 %s216_s9, 4  ;;  %p157_p0 = scmp.ne.s32.totalorder %s273_s0, %s156_s13  ;;  %s16_s10 = int_to_ptr.vmem [resolvable:$true] %s15_s10 }
   0x4   :  { %p160_p1 = scmp.lt.u32.totalorder %s156_s13, %s273_s0 }
   0x6   :  { %p162_p2 = pnand %p160_p1, %p157_p0 }
   0x8   :  { %165 = shalt.err (!%p162_p2)
}
   0x9   :  { %s166_s18 = scalar_lea.vmem %s16_s10, 256  ;;  %p171_p4 = scmp.lt.s32.totalorder %s16_s10, %s16_s10 }
   0xa   :  { %p167_p3 = scmp.ne.s32.totalorder %s16_s10, %s166_s18  ;;  %p172_p5 = scmp.lt.s32.totalorder %s166_s18, %s166_s18 }
   0xc   :  { %p173_p6 = por %p172_p5, %p171_p4 }
   0xe   :  { %p174_p7 = pnand %p173_p6, %p167_p3 }
  0x10   :  { %177 = shalt.err (!%p174_p7)
}
  0x11   :  { %s217_s19 = smov 128   ;;  %s218_s20 = smov 8  }
  0x12   :  { %21 = dma.hbm_to_vmem [thread:$0]  %s273_s0, 256, %s16_s10, [#allocation4], %s217_s19, %s217_s19, %s218_s20  }
  0x13   :  { %s219_s23 = smov [#allocation6]   ;;  %s178_s27 = scalar_lea.hbm %s274_s1, 256 }
  0x14   :  { %s27_s24 = sshll.u32 %s219_s23, 4  ;;  %p179_p8 = scmp.ne.s32.totalorder %s274_s1, %s178_s27  ;;  %s28_s24 = int_to_ptr.vmem [resolvable:$true] %s27_s24 }
  0x15   :  { %p182_p9 = scmp.lt.u32.totalorder %s178_s27, %s274_s1 }
  0x17   :  { %p184_p10 = pnand %p182_p9, %p179_p8 }
  0x19   :  { %187 = shalt.err (!%p184_p10)
}
  0x1a   :  { %s188_s4 = scalar_lea.vmem %s28_s24, 256  ;;  %p193_p12 = scmp.lt.s32.totalorder %s28_s24, %s28_s24 }
  0x1b   :  { %p189_p11 = scmp.ne.s32.totalorder %s28_s24, %s188_s4  ;;  %p194_p13 = scmp.lt.s32.totalorder %s188_s4, %s188_s4 }
  0x1d   :  { %p195_p0 = por %p194_p13, %p193_p12 }
  0x1f   :  { %p196_p1 = pnand %p195_p0, %p189_p11 }
  0x21   :  { %199 = shalt.err (!%p196_p1)
}
  0x22   :  { %33 = dma.hbm_to_vmem [thread:$0]  %s274_s1, 256, %s28_s24, [#allocation7], %s217_s19, %s217_s19, %s218_s20  }
  0x23   :  { %210 = dma.done.wait [#allocation4], 256  }
  0x24   :  { %211 = vsyncadd [#allocation4], 4294967040 }
  0x25   :  { %212 = dma.done.wait [#allocation7], 256  }
  0x26   :  { %213 = vsyncadd [#allocation7], 4294967040  ;;  %v220_v0 = vmov 0.0   ;;  %v45_v1 = vld [vmem:[#allocation3] sm:$0xff]  ;;  %v46_v2 = vld [vmem:[#allocation3 + $0x8] sm:$0xff]  ;;  %vm97_vm2 = vcmask 1040384  }
  0x27   :  { %44 = vst [vmem:[#allocation2] sm:$0x1] %v220_v0  ;;  %v55_v3 = vand.u32 2147483647, %v45_v1  ;;  %v56_v4 = vand.u32 2147483647, %v46_v2 }
  0x28   :  { %v47_v15 = vld [vmem:[#allocation6] sm:$0xff]  ;;  %v48_v16 = vld [vmem:[#allocation6 + $0x8] sm:$0xff]  ;;  %v49_v18 = vmax.f32 %v45_v1, 0.0  ;;  %v50_v22 = vmax.f32 %v46_v2, 0.0  ;;  %s200_s14 = scalar_lea.hbm %s275_s2, 16 }
  0x29   :  { %v57_v5 = vsub.f32 0.0, %v55_v3  ;;  %v58_v6 = vsub.f32 0.0, %v56_v4  ;;  %v51_v19 = vmul.f32 %v47_v15, %v45_v1  ;;  %v52_v23 = vmul.f32 %v48_v16, %v46_v2  ;;  %p201_p2 = scmp.ne.s32.totalorder %s275_s2, %s200_s14  ;;  %p204_p3 = scmp.lt.u32.totalorder %s200_s14, %s275_s2 }
  0x2b   :  { %v59_v7 = vmul.f32 1.442695, %v57_v5  ;;  %v61_v8 = vmul.f32 1.442695, %v58_v6  ;;  %v53_v27 = vsub.f32 %v49_v18, %v51_v19  ;;  %v54_v30 = vsub.f32 %v50_v22, %v52_v23  ;;  %p206_p4 = pnand %p204_p3, %p201_p2 }
  0x2d   :  { %146 = vpow2.f32 %v59_v7 }
  0x2e   :  { %148 = vpow2.f32 %v61_v8  ;;  %v83_v43 = vld [vmem:[#allocation2] sm:$0x1] }
  0x37   :  { %v147_v9 = vpop.eup %146 }
  0x38   :  { %v149_v10 = vpop.eup %148  ;;  %v63_v11 = vadd.f32 1.0, %v147_v9  ;;  %v66_v13 = vmul.f32 -0.5, %v147_v9  ;;  %v69_v20 = vand.u32 2147483647, %v147_v9 }
  0x39   :  { %v72_v12 = vadd.f32 1.0, %v149_v10  ;;  %v75_v14 = vmul.f32 -0.5, %v149_v10  ;;  %v78_v24 = vand.u32 2147483647, %v149_v10 }
  0x3a   :  { %150 = vlog2.f32 %v63_v11  ;;  %v67_v17 = vadd.f32 1.0, %v66_v13  ;;  %vm70_vm0 = vcmp.lt.f32.partialorder %v69_v20, 0.0004427343 }
  0x3b   :  { %152 = vlog2.f32 %v72_v12  ;;  %v76_v21 = vadd.f32 1.0, %v75_v14  ;;  %vm79_vm1 = vcmp.lt.f32.partialorder %v78_v24, 0.0004427343 }
  0x3c   :  { %v68_v25 = vmul.f32 %v147_v9, %v67_v17 }
  0x3d   :  { %v77_v28 = vmul.f32 %v149_v10, %v76_v21 }
  0x44   :  { %v151_v26 = vpop.eup %150 }
  0x45   :  { %v153_v29 = vpop.eup %152  ;;  %v65_v31 = vmul.f32 0.6931472, %v151_v26 }
  0x46   :  { %v74_v32 = vmul.f32 0.6931472, %v153_v29 }
  0x47   :  { %v71_v33 = vsel %vm70_vm0, %v68_v25, %v65_v31 }
  0x48   :  { %v80_v34 = vsel %vm79_vm1, %v77_v28, %v74_v32  ;;  %v81_v35 = vadd.f32 %v71_v33, %v53_v27 }
  0x49   :  { %v82_v36 = vadd.f32 %v80_v34, %v54_v30 }
  0x4b   :  { %v84_v37 = vadd.f32 %v82_v36, %v81_v35 }
  0x4d   :  { %v85_v38 = vrot.slane %v84_v37, 4 }
  0x4f   :  { %v86_v39 = vadd.f32 %v85_v38, %v84_v37 }
  0x51   :  { %v87_v40 = vrot.slane %v86_v39, 2 }
  0x53   :  { %v88_v41 = vadd.f32 %v87_v40, %v86_v39 }
  0x55   :  { %v89_v42 = vrot.slane %v88_v41, 1 }
  0x57   :  { %v90_v44 = vadd.f32 %v89_v42, %v88_v41 }
  0x59   :  { %v91_v45 = vadd.f32 %v90_v44, %v83_v43 }
  0x5b   :  { %92 = vst [vmem:[#allocation2] sm:$0x1] %v91_v45 }
  0x62   :  { %v96_v46 = vld [vmem:[#allocation2] sm:$0x1] }
  0x63   :  { %v98_v47 = vsel %vm97_vm2, %v96_v46, 0.0 }
  0x64   :  { %99 = vadd.xlane.f32.xlu0 %v98_v47 }
  0xf1   :  { %v100_v48 = vpop.xlane.xlu0 %99 }
  0xf2   :  { %v101_v49 = vrot.slane %v100_v48, 4 }
  0xf4   :  { %v102_v50 = vadd.f32 %v101_v49, %v100_v48 }
  0xf6   :  { %v103_v51 = vrot.slane %v102_v50, 2 }
  0xf8   :  { %v104_v52 = vadd.f32 %v103_v51, %v102_v50 }
  0xfa   :  { %v105_v53 = vrot.slane %v104_v52, 1 }
  0xfc   :  { %v106_v54 = vadd.f32 %v105_v53, %v104_v52 }
  0xfe   :  { %136 = vpush %v106_v54 }
 0x12f   :  { %s137_s1 = spop %136 }
 0x130   :  { %s110_s6 = smul.f32 0.00048828125, %s137_s1 }
 0x132   :  { %s111_s7 = ssub.f32 0.0, %s110_s6 }
 0x134   :  { %v112_v55 = vstv %s111_s7 }
 0x135   :  { %v113_v56 = vmul.f32 1.442695, %v112_v55 }
 0x137   :  { %154 = vpow2.f32 %v113_v56 }
 0x141   :  { %v155_v57 = vpop.eup %154 }
 0x142   :  { %138 = vpush %v155_v57 }
 0x173   :  { %s139_s8 = spop %138 }
 0x174   :  { %s116_s9 = ssub.f32 1.0, %s139_s8 }
 0x176   :  { %s117_s10 = smul.f32 %s116_s9, %s116_s9 }
 0x178   :  { %s118_s11 = smul.f32 %s117_s10, %s110_s6 }
 0x17a   :  { %120 = sst [smem:[#allocation8]] %s118_s11 }
 0x17b   :  { %209 = shalt.err (!%p206_p4)
}
 0x17c   :  { %s221_s19 = smov [#allocation8]  }
 0x17d   :  { %128 = dma.smem_to_hbm %s221_s19, 16, %s275_s2, [#allocation5]  }
 0x17e   :  { %214 = dma.done.wait [#allocation5], 16  }
 0x17f   :  { %215 = vsyncadd [#allocation5], 4294967280 }
 0x180   :  { %132 = sfence }
 0x181   :  { %133 = vsyncpa [#allocation4], 1 }
 0x182   :  { %134 = vsyncpa [#allocation7], 1 }
 0x183   :  { %135 = vsyncpa [#allocation5], 1 }

</bundles_post_ra>
